<compile_context>
chip_gen: v6e
topology: v6e:2x2x1
jax: 0.10.0
libtpu: 0.0.40
codegen_flags: <defaults>
</compile_context>

<pallas_src>
import jax
import jax.numpy as jnp
from jax.experimental import pallas as pl
from jax.experimental.pallas import tpu as pltpu

LANE_WIDTH = 512          # batch elements per lane row (must be a multiple of 128)
MAX_ROWS_PER_TILE = 1024  # 1024 rows * 512 lanes = 512K batch elems per grid step
                          #  -> (2+1)*1024*512*4 B * 2 (double-buffer) ~= 12 MiB VMEM


def make_teacher_kernel(D_in, H, D_out):
    """Kernel body, fully unrolled for the tiny layer sizes (2 -> 4 -> 1).

    sigmoid(p) is computed as 0.5*tanh(0.5*p) + 0.5 with both 0.5 factors folded
    into the (host-side, scalar-only) weights, so each hidden unit costs exactly
    one EUP transcendental.
    """

    def kernel(w1_ref, w2_ref, b2_ref, x_ref, o_ref):
        # w1_ref: (D_in*H,)      f32 SMEM  -- 0.5 * W1, row-major over (d, j)
        # w2_ref: (H*D_out,)     f32 SMEM  -- 0.5 * W2, row-major over (j, o)
        # b2_ref: (D_out,)       f32 SMEM  -- 0.5 * sum_j W2[j, o]
        # x_ref : (D_in, Rt, LW) f32 VMEM  -- batch dense on sublanes AND lanes
        # o_ref : (D_out, Rt, LW) f32 VMEM -- lane-dense, unmasked stores
        feats = [x_ref[d] for d in range(D_in)]            # each (Rt, LW) slab

        hidden = []
        for j in range(H):                                 # H = 4: fully unrolled
            pre = feats[0] * w1_ref[j]                     # SMEM scalar bcast (VPU)
            for d in range(1, D_in):
                pre = pre + feats[d] * w1_ref[d * H + j]
            hidden.append(jnp.tanh(pre))                   # single EUP push

        for o in range(D_out):                             # D_out = 1
            y = hidden[0] * w2_ref[o]
            for j in range(1, H):
                y = y + hidden[j] * w2_ref[j * D_out + o]
            o_ref[o] = y + b2_ref[o]                       # dense f32 store

    return kernel


def teacher_forward_planar(xp, w1, w2, *,
                           lane_width=LANE_WIDTH,
                           rows_per_tile=MAX_ROWS_PER_TILE):
    """Fast path. xp: (D_in, B) feature-major f32 -> (D_out, B) f32.

    For peak throughput the producer should hand over xp with B a multiple of
    `lane_width` (512); otherwise a one-off pad pass is inserted here.
    """
    xp = jnp.asarray(xp, jnp.float32)
    D_in, B = xp.shape
    w1 = jnp.asarray(w1, jnp.float32)
    w2 = jnp.asarray(w2, jnp.float32)
    H = w1.shape[1]
    D_out = w2.shape[1]

    LW = int(lane_width)
    assert LW % 128 == 0, "lane_width must be a multiple of 128"

    n_rows = pl.cdiv(B, LW)
    if n_rows <= rows_per_tile:
        Rt = max(int(n_rows), 1)        # single tile: full-extent rows are legal
        n_tiles = 1
    else:
        Rt = max((int(rows_per_tile) // 8) * 8, 8)   # keep tiles sublane-aligned
        n_tiles = int(pl.cdiv(n_rows, Rt))
    NR = n_tiles * Rt
    Bp = NR * LW

    if Bp != B:
        # TODO(synk): for large, non-aligned B this pad is an extra HBM pass; feed
        # the kernel a batch padded to a multiple of lane_width upstream instead.
        xp = jnp.pad(xp, ((0, 0), (0, Bp - B)))
    x3 = xp.reshape(D_in, NR, LW)                      # zero-copy reshape

    # Fold the sigmoid-as-tanh constants into the 12 weight scalars (host side,
    # scalars only -- not a per-element prescale pass).
    w1f = (0.5 * w1).reshape(-1)                       # (D_in*H,)
    w2f = (0.5 * w2).reshape(-1)                       # (H*D_out,)
    b2 = 0.5 * jnp.sum(w2, axis=0)                     # (D_out,)

    out3 = pl.pallas_call(
        make_teacher_kernel(D_in, H, D_out),
        out_shape=jax.ShapeDtypeStruct((D_out, NR, LW), jnp.float32),
        grid=(n_tiles,),
        in_specs=[
            pl.BlockSpec(memory_space=pltpu.MemorySpace.SMEM),   # 0.5*W1 scalars
            pl.BlockSpec(memory_space=pltpu.MemorySpace.SMEM),   # 0.5*W2 scalars
            pl.BlockSpec(memory_space=pltpu.MemorySpace.SMEM),   # 0.5*sum(W2)
            pl.BlockSpec((D_in, Rt, LW), lambda i: (0, i, 0)),   # x batch tile
        ],
        out_specs=pl.BlockSpec((D_out, Rt, LW), lambda i: (0, i, 0)),
        compiler_params=pltpu.CompilerParams(
            # Batch tiles are fully independent. On v7x, swapping this to
            # pltpu.CORE_PARALLEL forces an explicit 2-TensorCore split of the
            # batch axis (keep n_tiles >= 2 there).
            dimension_semantics=("parallel",),
        ),
    )(w1f, w2f, b2, x3)

    return out3.reshape(D_out, Bp)[:, :B]


def teacher_forward(x, w1, w2, **kw):
    """Compatibility wrapper matching the torch module: x (B, D_in) -> (B, D_out).

    TODO(synk): the transpose below is a separate XLA pass; for large batches
    produce x feature-major and call teacher_forward_planar directly.
    """
    x = jnp.asarray(x, jnp.float32)
    return teacher_forward_planar(x.T, w1, w2, **kw).T


def make_teacher_params():
    # Exactly the constants from TeacherNetwork.__init__, laid out so forward is
    # x @ W1 then h @ W2.
    w1 = jnp.array([[0.6, -0.5, -0.2, 0.1],
                    [0.5, 0.5, -0.6, -0.6]], dtype=jnp.float32)        # (D_in=2, H=4)
    w2 = jnp.array([[1.0], [-1.0], [1.0], [-1.0]], dtype=jnp.float32)  # (H=4, D_out=1)
    return w1, w2


if __name__ == "__main__":
    key = jax.random.PRNGKey(0)
    B, D_in = 8, 2
    x = jax.random.normal(key, (B, D_in), dtype=jnp.float32)

    w1, w2 = make_teacher_params()

    y = teacher_forward(x, w1, w2)
    y = jax.block_until_ready(y)

    # Pure-JAX reference check of the forward semantics.
    y_ref = jax.nn.sigmoid(x @ w1) @ w2
    assert y.shape == (B, 1)
    assert jnp.allclose(y, y_ref, atol=1e-5, rtol=1e-5)

    # Also exercise the transpose-free fast path (feature-major input/output).
    y_planar = jax.block_until_ready(teacher_forward_planar(x.T, w1, w2))
    assert y_planar.shape == (1, B)
    assert jnp.allclose(y_planar, y_ref.T, atol=1e-5, rtol=1e-5)

    print("KERNEL_OK")
</pallas_src>

<mosaic_0001>
module attributes {stable_mosaic.version = 11 : i64} {
  func.func @kernel(%arg0: i32, %arg1: memref<8xf32, #tpu.memory_space<smem>>, %arg2: memref<4xf32, #tpu.memory_space<smem>>, %arg3: memref<1xf32, #tpu.memory_space<smem>>, %arg4: memref<2x1x512xf32, #tpu.memory_space<vmem>>, %arg5: memref<1x1x512xf32, #tpu.memory_space<vmem>>) attributes {dimension_semantics = [#tpu.dimension_semantics<parallel>], iteration_bounds = array<i64: 1>, scalar_prefetch = 0 : i64, scratch_operands = 0 : i64, tpu.core_type = #tpu.core_type<tc>, window_params = [{transform_indices = @transform_0, window_bounds = array<i64: 8>}, {transform_indices = @transform_1, window_bounds = array<i64: 4>}, {transform_indices = @transform_2, window_bounds = array<i64: 1>}, {transform_indices = @transform_3, window_bounds = array<i64: 2, 1, 512>}, {transform_indices = @transform_4, window_bounds = array<i64: 1, 1, 512>}]} {
    %c0 = arith.constant 0 : index
    %c0_0 = arith.constant 0 : index
    %c0_1 = arith.constant 0 : index
    %0 = vector.load %arg4[%c0, %c0_0, %c0_1] : memref<2x1x512xf32, #tpu.memory_space<vmem>>, vector<1x1x512xf32>
    %1 = vector.shape_cast %0 : vector<1x1x512xf32> to vector<1x512xf32>
    %c1 = arith.constant 1 : index
    %c0_2 = arith.constant 0 : index
    %c0_3 = arith.constant 0 : index
    %2 = vector.load %arg4[%c1, %c0_2, %c0_3] : memref<2x1x512xf32, #tpu.memory_space<vmem>>, vector<1x1x512xf32>
    %3 = vector.shape_cast %2 : vector<1x1x512xf32> to vector<1x512xf32>
    %c0_4 = arith.constant 0 : index
    %4 = memref.load %arg1[%c0_4] : memref<8xf32, #tpu.memory_space<smem>>
    %5 = vector.broadcast %4 : f32 to vector<1x512xf32>
    %6 = arith.mulf %1, %5 : vector<1x512xf32>
    %c4 = arith.constant 4 : index
    %7 = memref.load %arg1[%c4] : memref<8xf32, #tpu.memory_space<smem>>
    %8 = vector.broadcast %7 : f32 to vector<1x512xf32>
    %9 = arith.mulf %3, %8 : vector<1x512xf32>
    %10 = arith.addf %6, %9 : vector<1x512xf32>
    %11 = math.tanh %10 : vector<1x512xf32>
    %c1_5 = arith.constant 1 : index
    %12 = memref.load %arg1[%c1_5] : memref<8xf32, #tpu.memory_space<smem>>
    %13 = vector.broadcast %12 : f32 to vector<1x512xf32>
    %14 = arith.mulf %1, %13 : vector<1x512xf32>
    %c5 = arith.constant 5 : index
    %15 = memref.load %arg1[%c5] : memref<8xf32, #tpu.memory_space<smem>>
    %16 = vector.broadcast %15 : f32 to vector<1x512xf32>
    %17 = arith.mulf %3, %16 : vector<1x512xf32>
    %18 = arith.addf %14, %17 : vector<1x512xf32>
    %19 = math.tanh %18 : vector<1x512xf32>
    %c2 = arith.constant 2 : index
    %20 = memref.load %arg1[%c2] : memref<8xf32, #tpu.memory_space<smem>>
    %21 = vector.broadcast %20 : f32 to vector<1x512xf32>
    %22 = arith.mulf %1, %21 : vector<1x512xf32>
    %c6 = arith.constant 6 : index
    %23 = memref.load %arg1[%c6] : memref<8xf32, #tpu.memory_space<smem>>
    %24 = vector.broadcast %23 : f32 to vector<1x512xf32>
    %25 = arith.mulf %3, %24 : vector<1x512xf32>
    %26 = arith.addf %22, %25 : vector<1x512xf32>
    %27 = math.tanh %26 : vector<1x512xf32>
    %c3 = arith.constant 3 : index
    %28 = memref.load %arg1[%c3] : memref<8xf32, #tpu.memory_space<smem>>
    %29 = vector.broadcast %28 : f32 to vector<1x512xf32>
    %30 = arith.mulf %1, %29 : vector<1x512xf32>
    %c7 = arith.constant 7 : index
    %31 = memref.load %arg1[%c7] : memref<8xf32, #tpu.memory_space<smem>>
    %32 = vector.broadcast %31 : f32 to vector<1x512xf32>
    %33 = arith.mulf %3, %32 : vector<1x512xf32>
    %34 = arith.addf %30, %33 : vector<1x512xf32>
    %35 = math.tanh %34 : vector<1x512xf32>
    %c0_6 = arith.constant 0 : index
    %36 = memref.load %arg2[%c0_6] : memref<4xf32, #tpu.memory_space<smem>>
    %37 = vector.broadcast %36 : f32 to vector<1x512xf32>
    %38 = arith.mulf %11, %37 : vector<1x512xf32>
    %c1_7 = arith.constant 1 : index
    %39 = memref.load %arg2[%c1_7] : memref<4xf32, #tpu.memory_space<smem>>
    %40 = vector.broadcast %39 : f32 to vector<1x512xf32>
    %41 = arith.mulf %19, %40 : vector<1x512xf32>
    %42 = arith.addf %38, %41 : vector<1x512xf32>
    %c2_8 = arith.constant 2 : index
    %43 = memref.load %arg2[%c2_8] : memref<4xf32, #tpu.memory_space<smem>>
    %44 = vector.broadcast %43 : f32 to vector<1x512xf32>
    %45 = arith.mulf %27, %44 : vector<1x512xf32>
    %46 = arith.addf %42, %45 : vector<1x512xf32>
    %c3_9 = arith.constant 3 : index
    %47 = memref.load %arg2[%c3_9] : memref<4xf32, #tpu.memory_space<smem>>
    %48 = vector.broadcast %47 : f32 to vector<1x512xf32>
    %49 = arith.mulf %35, %48 : vector<1x512xf32>
    %50 = arith.addf %46, %49 : vector<1x512xf32>
    %c0_10 = arith.constant 0 : index
    %51 = memref.load %arg3[%c0_10] : memref<1xf32, #tpu.memory_space<smem>>
    %52 = vector.broadcast %51 : f32 to vector<1x512xf32>
    %53 = arith.addf %50, %52 : vector<1x512xf32>
    %c0_11 = arith.constant 0 : index
    %c0_12 = arith.constant 0 : index
    %c0_13 = arith.constant 0 : index
    %54 = vector.load %arg5[%c0_11, %c0_12, %c0_13] : memref<1x1x512xf32, #tpu.memory_space<vmem>>, vector<1x1x512xf32>
    %55 = vector.shape_cast %54 : vector<1x1x512xf32> to vector<1x512xf32>
    %56 = vector.shape_cast %53 : vector<1x512xf32> to vector<1x1x512xf32>
    tpu.vector_store %arg5[%c0_11, %c0_12, %c0_13], %56 {strides = array<i32>} : memref<1x1x512xf32, #tpu.memory_space<vmem>>, vector<1x1x512xf32>,
    return
  }
  func.func @transform_0(%arg0: i32) -> i32 {
    %c0_i32 = arith.constant 0 : i32
    %c0_i32_0 = arith.constant 0 : i32
    return %c0_i32 : i32
  }
  func.func @transform_1(%arg0: i32) -> i32 {
    %c0_i32 = arith.constant 0 : i32
    %c0_i32_0 = arith.constant 0 : i32
    return %c0_i32 : i32
  }
  func.func @transform_2(%arg0: i32) -> i32 {
    %c0_i32 = arith.constant 0 : i32
    %c0_i32_0 = arith.constant 0 : i32
    return %c0_i32 : i32
  }
  func.func @transform_3(%arg0: i32) -> (i32, i32, i32) {
    %c0_i32 = arith.constant 0 : i32
    %c0_i32_0 = arith.constant 0 : i32
    %c0_i32_1 = arith.constant 0 : i32
    return %c0_i32, %arg0, %c0_i32_0 : i32, i32, i32
  }
  func.func @transform_4(%arg0: i32) -> (i32, i32, i32) {
    %c0_i32 = arith.constant 0 : i32
    %c0_i32_0 = arith.constant 0 : i32
    %c0_i32_1 = arith.constant 0 : i32
    return %c0_i32, %arg0, %c0_i32_0 : i32, i32, i32
  }
}

</mosaic_0001>

<bundles_post_ra>
// kernel: tpu_custom_call.1
= control target key start
LH: loop header
LB: loop body
LE: loop exit
PB: predicated region body
PF: predicated region fallthrough
CT: control target
= control target key end

     0   :  { %10 = vsyncpa [#allocation6], 0  ;;  %s275_s0 = inlined_call_operand.vmem [shape: f32[8], index: 0, kind: input, shape index: {}]   ;;  %s276_s1 = inlined_call_operand.vmem [shape: f32[4], index: 1, kind: input, shape index: {}]   ;;  %s277_s2 = inlined_call_operand.<no memory space> [shape: f32[1], index: 2, kind: input, shape index: {}]   ;;  %s278_s3 = inlined_call_operand.hbm [shape: f32[2,1,512], index: 3, kind: input, shape index: {}]   ;;  %s279_s4 = inlined_call_operand.hbm [shape: f32[1,1,512], index: 4, kind: output, shape index: {}]  }
   0x1   :  { %11 = vsyncpa [#allocation8], 0 }
   0x2   :  { %12 = vsyncpa [#allocation4], 0 }
   0x3   :  { %13 = vsyncpa [#allocation5], 0  ;;  %s20_s17 = sshll.u32 %s275_s0, 4  ;;  %s30_s20 = sshll.u32 %s276_s1, 4  ;;  %s21_s17 = int_to_ptr.vmem [resolvable:$true] %s20_s17  ;;  %s31_s20 = int_to_ptr.vmem [resolvable:$true] %s30_s20 }
   0x4   :  { %s157_s21 = scalar_lea.vmem %s21_s17, 16  ;;  %p162_p1 = scmp.lt.s32.totalorder %s21_s17, %s21_s17 }
   0x5   :  { %p158_p0 = scmp.ne.s32.totalorder %s21_s17, %s157_s21  ;;  %p163_p2 = scmp.lt.s32.totalorder %s157_s21, %s157_s21 }
   0x7   :  { %p164_p3 = por %p163_p2, %p162_p1 }
   0x9   :  { %p165_p4 = pnand %p164_p3, %p158_p0 }
   0xb   :  { %168 = shalt.err (!%p165_p4)
}
   0xc   :  { %s229_s22 = smov [#allocation3]   ;;  %s169_s23 = scalar_lea.vmem %s31_s20, 16 }
   0xd   :  { %23 = dma.vmem_to_smem %s21_s17, 16, %s229_s22, [#allocation6]  }
   0xe   :  { %p170_p5 = scmp.ne.s32.totalorder %s31_s20, %s169_s23  ;;  %p174_p6 = scmp.lt.s32.totalorder %s31_s20, %s31_s20 }
   0xf   :  { %p175_p7 = scmp.lt.s32.totalorder %s169_s23, %s169_s23 }
  0x11   :  { %p176_p8 = por %p175_p7, %p174_p6 }
  0x13   :  { %p177_p9 = pnand %p176_p8, %p170_p5 }
  0x15   :  { %180 = shalt.err (!%p177_p9)
}
  0x16   :  { %s230_s0 = smov [#allocation7]   ;;  %s231_s1 = smov [#allocation9]  }
  0x17   :  { %33 = dma.vmem_to_smem %s31_s20, 16, %s230_s0, [#allocation8]  }
  0x18   :  { %s41_s24 = sshll.u32 %s231_s1, 4  ;;  %s42_s24 = int_to_ptr.vmem [resolvable:$true] %s41_s24 }
  0x19   :  { %s189_s25 = scalar_lea.vmem %s42_s24, 128  ;;  %p194_p11 = scmp.lt.s32.totalorder %s42_s24, %s42_s24 }
  0x1a   :  { %p190_p10 = scmp.ne.s32.totalorder %s42_s24, %s189_s25  ;;  %p195_p12 = scmp.lt.s32.totalorder %s189_s25, %s189_s25 }
  0x1c   :  { %p196_p13 = por %p195_p12, %p194_p11 }
  0x1e   :  { %p197_p0 = pnand %p196_p13, %p190_p10 }
  0x20   :  { %200 = shalt.err (!%p197_p0)
}
  0x21   :  { %s232_s26 = smov 64   ;;  %s233_s27 = smov 4  }
  0x22   :  { %47 = dma.hbm_to_vmem [thread:$0]  %s278_s3, 128, %s42_s24, [#allocation4], %s232_s26, %s232_s26, %s233_s27  }
  0x23   :  { %221 = dma.done.wait [#allocation6], 16  }
  0x24   :  { %222 = vsyncadd [#allocation6], 4294967280 }
  0x25   :  { %223 = dma.done.wait [#allocation8], 16  }
  0x26   :  { %224 = vsyncadd [#allocation8], 4294967280 }
  0x27   :  { %225 = dma.done.wait [#allocation4], 128  }
  0x28   :  { %226 = vsyncadd [#allocation4], 4294967168 }
  0x29   :  { %57 = sfence }
  0x2a   :  { %s61_s30 = sld [smem:[#allocation3]]  ;;  %v58_v0 = vld [vmem:[#allocation9] sm:$0xf]  ;;  %v60_v1 = vld [vmem:[#allocation9 + $0x4] sm:$0xf]  ;;  %v111_v34 = vlaneseq  ;;  %v109_v37 = vstv %s277_s2  ;;  %s234_s17 = smov [#allocation10]  }
  0x2b   :  { %s133_s5 = sld [smem:[#allocation3 + $0x4]]  ;;  %s122_s18 = sshll.u32 %s234_s17, 4  ;;  %s123_s18 = int_to_ptr.vmem [resolvable:$true] %s122_s18 }
  0x2c   :  { %s134_s6 = sld [smem:[#allocation3 + $0x1]]  ;;  %vm113_vm0 = vcmp.lt.s32.totalorder %v111_v34, 512  ;;  %s201_s19 = scalar_lea.vmem %s123_s18, 64 }
  0x2d   :  { %s135_s7 = sld [smem:[#allocation3 + $0x5]]  ;;  %p202_p1 = scmp.ne.s32.totalorder %s123_s18, %s201_s19 }
  0x2e   :  { %s136_s8 = sld [smem:[#allocation3 + $0x2]]  ;;  %p206_p2 = scmp.lt.s32.totalorder %s123_s18, %s123_s18 }
  0x2f   :  { %s137_s9 = sld [smem:[#allocation3 + $0x6]]  ;;  %p207_p3 = scmp.lt.s32.totalorder %s201_s19, %s201_s19 }
  0x30   :  { %v62_v2 = vstv %s61_s30  ;;  %s138_s10 = sld [smem:[#allocation3 + $0x3]] }
  0x31   :  { %v63_v3 = vmul.f32 %v62_v2, %v58_v0  ;;  %v65_v4 = vstv %s133_s5  ;;  %s139_s3 = sld [smem:[#allocation3 + $0x7]]  ;;  %p208_p4 = por %p207_p3, %p206_p2 }
  0x32   :  { %v66_v5 = vmul.f32 %v65_v4, %v60_v1  ;;  %v70_v6 = vstv %s134_s6  ;;  %s93_s11 = sld [smem:[#allocation7]] }
  0x33   :  { %v71_v7 = vmul.f32 %v70_v6, %v58_v0  ;;  %v73_v8 = vstv %s135_s7  ;;  %s140_s12 = sld [smem:[#allocation7 + $0x1]]  ;;  %p209_p5 = pnand %p208_p4, %p202_p1 }
  0x34   :  { %v67_v9 = vadd.f32 %v66_v5, %v63_v3  ;;  %v74_v10 = vmul.f32 %v73_v8, %v60_v1  ;;  %v78_v11 = vstv %s136_s8  ;;  %s141_s13 = sld [smem:[#allocation7 + $0x2]] }
  0x35   :  { %v79_v12 = vmul.f32 %v78_v11, %v58_v0  ;;  %v81_v13 = vstv %s137_s9  ;;  %s142_s14 = sld [smem:[#allocation7 + $0x3]] }
  0x36   :  { %149 = vtanh.f32 %v67_v9  ;;  %v75_v14 = vadd.f32 %v74_v10, %v71_v7  ;;  %v82_v15 = vmul.f32 %v81_v13, %v60_v1  ;;  %v86_v16 = vstv %s138_s10 }
  0x37   :  { %v87_v17 = vmul.f32 %v86_v16, %v58_v0  ;;  %v89_v18 = vstv %s139_s3 }
  0x38   :  { %151 = vtanh.f32 %v75_v14  ;;  %v83_v19 = vadd.f32 %v82_v15, %v79_v12  ;;  %v90_v20 = vmul.f32 %v89_v18, %v60_v1  ;;  %v94_v22 = vstv %s93_s11 }
  0x39   :  { %v97_v24 = vstv %s140_s12 }
  0x3a   :  { %153 = vtanh.f32 %v83_v19  ;;  %v91_v21 = vadd.f32 %v90_v20, %v87_v17  ;;  %v101_v27 = vstv %s141_s13 }
  0x3b   :  { %v105_v30 = vstv %s142_s14 }
  0x3c   :  { %155 = vtanh.f32 %v91_v21 }
  0x43   :  { %v150_v23 = vpop.eup %149 }
  0x44   :  { %v95_v25 = vmul.f32 %v150_v23, %v94_v22 }
  0x45   :  { %v152_v26 = vpop.eup %151 }
  0x46   :  { %v98_v28 = vmul.f32 %v152_v26, %v97_v24 }
  0x47   :  { %v154_v29 = vpop.eup %153 }
  0x48   :  { %v99_v31 = vadd.f32 %v98_v28, %v95_v25  ;;  %v102_v32 = vmul.f32 %v154_v29, %v101_v27 }
  0x49   :  { %v156_v33 = vpop.eup %155 }
  0x4a   :  { %v103_v35 = vadd.f32 %v102_v32, %v99_v31  ;;  %v106_v36 = vmul.f32 %v156_v33, %v105_v30 }
  0x4c   :  { %v107_v38 = vadd.f32 %v106_v36, %v103_v35 }
  0x4e   :  { %v110_v39 = vadd.f32 %v109_v37, %v107_v38 }
  0x50   :  { %115 = vst.msk [vmem:[#allocation10] sm:$0xf] %vm113_vm0, %v110_v39 }
  0x51   :  { %212 = shalt.err (!%p209_p5)
}
  0x52   :  { %125 = dma.vmem_to_hbm [thread:$0]  %s123_s18, 64, %s279_s4, [#allocation5]  }
  0x53   :  { %227 = dma.done.wait [#allocation5], 64  }
  0x54   :  { %228 = vsyncadd [#allocation5], 4294967232 }
  0x55   :  { %129 = vsyncpa [#allocation4], 1 }
  0x56   :  { %130 = vsyncpa [#allocation5], 1 }
  0x57   :  { %131 = vsyncpa [#allocation6], 1 }
  0x58   :  { %132 = vsyncpa [#allocation8], 1 }

</bundles_post_ra>
